<compile_context>
chip_gen: v7x
topology: tpu7x:2x2x1
jax: 0.10.0
libtpu: 0.0.40
codegen_flags: <defaults>
</compile_context>

<pallas_src>
import functools

import jax
import jax.numpy as jnp
from jax import lax
from jax.experimental import pallas as pl
from jax.experimental.pallas import tpu as pltpu


def _talking_head_kernel(H, x_ref, wqkv_ref, wlbig_ref, wwkron_ref, bwbig_ref,
                         hmask_ref, wp_ref, bproj_ref, o_ref):
    """One batch block per grid step; everything resident in VMEM."""
    Bb, S, E = x_ref.shape

    # ---- fused QKV projection, merged over the batch block (one MXU matmul,
    #      M = Bb*S, N = 3E, f32 accumulation) -------------------------------
    x = x_ref[...].reshape(Bb * S, E).astype(jnp.bfloat16)
    qkv = jnp.dot(x, wqkv_ref[...],
                  preferred_element_type=jnp.float32).astype(jnp.bfloat16)
    q_all = qkv[:, :E]                                              # (Bb*S, E)
    k_all = qkv[:, E:2 * E]
    v_all = qkv[:, 2 * E:]

    wl_big = wlbig_ref[...]                                         # (H*S, E)   bf16
    ww_kron = wwkron_ref[...]                                       # (H*S, H*S) bf16
    bw_big = bwbig_ref[...]                                         # (H*S, 1)   f32
    wp = wp_ref[...]                                                # (E, E)     bf16
    bproj = bproj_ref[...]                                          # (1, E)     f32

    for bi in range(Bb):
        r0, r1 = bi * S, (bi + 1) * S
        q2 = q_all[r0:r1, :]                                        # (S, E)
        k2 = k_all[r0:r1, :]
        v = v_all[r0:r1, :]

        # Scores for all H output heads in ONE matmul, proj_l fused:
        #   rows [g*S:(g+1)*S] of q_stk hold q2 * wl_rep[g]
        #   => logits[g*S+s, t] = sum_h wl[g,h] * (q_h @ k_h^T)[s,t]
        q_stk = jnp.tile(q2, (H, 1)) * wl_big                       # (H*S, E) bf16
        logits = lax.dot_general(q_stk, k2, (((1,), (1,)), ((), ())),
                                 preferred_element_type=jnp.float32)  # (H*S, S)
        # bl[g] is constant along the softmax axis -> cancelled by the max
        # subtraction; intentionally not added.

        # Softmax over keys, vectorized across all heads.
        logits = logits - jnp.max(logits, axis=-1, keepdims=True)
        p = jnp.exp(logits)
        p = p * pl.reciprocal(jnp.sum(p, axis=-1, keepdims=True), approx=True)

        # proj_w mix on the MXU: kron(ww, I_S) @ probs == per output head h:
        #   mixed_h = sum_g ww[h,g] * probs_g ; then + bw broadcast.
        mixed = jnp.dot(ww_kron, p.astype(jnp.bfloat16),
                        preferred_element_type=jnp.float32) + bw_big  # (H*S, S)

        # attn @ v for all heads in one matmul; lane-pack the context by
        # keeping only head h's hd columns from block h.
        ctxall = jnp.dot(mixed.astype(jnp.bfloat16), v,
                         preferred_element_type=jnp.float32)          # (H*S, E)
        ctx = ctxall[0:S, :] * hmask_ref[0:1, :]
        for h in range(1, H):
            ctx = ctx + ctxall[h * S:(h + 1) * S, :] * hmask_ref[h:h + 1, :]

        # Single full-K output projection + bias.
        out = jnp.dot(ctx.astype(jnp.bfloat16), wp,
                      preferred_element_type=jnp.float32) + bproj     # (S, E)
        # NOTE: last dim E=32 (<128) -> masked partial stores; acceptable here.
        o_ref[bi] = out.astype(o_ref.dtype)


def _pick_batch_block(B):
    """v7x has 2 TensorCores -> keep >= 2 parallel grid steps; v5e/v6e have a
    single TC -> collapse to one grid step (per-step overhead dominates at
    this problem size)."""
    kind = ""
    try:
        kind = jax.devices()[0].device_kind.lower()
    except Exception:
        pass
    steps = 2 if ("v7" in kind and B >= 2) else 1
    bb = max(1, B // steps)
    while B % bb:
        bb -= 1
    return bb


def attn_talking_head(x, wqkv, wl, bl, ww, bw, wproj, bproj):
    """x: (B, S, E) float32.  Weights in math layout (y = x @ W + b).
    Returns (B, S, E).  `bl` (proj_l bias) is accepted for parameter parity
    but is mathematically a no-op under softmax shift invariance."""
    del bl
    B, S, E = x.shape
    H = wl.shape[0]
    assert E % H == 0, "embed_dim must be divisible by num_heads"
    hd = E // H
    cdt = jnp.bfloat16

    Bb = _pick_batch_block(B)

    wqkv_b = wqkv.astype(cdt)                                          # (E, 3E)
    # proj_l fused into the score matmul; one row per (output head, query row).
    wl_rep = jnp.repeat(wl, hd, axis=1)                                # (H, E)
    wl_big = jnp.repeat(wl_rep, S, axis=0).astype(cdt)                 # (H*S, E)
    # proj_w as a single MXU matmul on head-stacked probabilities.
    ww_kron = jnp.kron(ww, jnp.eye(S, dtype=ww.dtype)).astype(cdt)     # (H*S, H*S)
    bw_big = jnp.repeat(bw, S).reshape(H * S, 1).astype(jnp.float32)   # (H*S, 1)
    # Head-column mask used to lane-pack per-head contexts into (S, E).
    hmask = (jnp.arange(E)[None, :] // hd ==
             jnp.arange(H)[:, None]).astype(jnp.float32)               # (H, E)
    wp_b = wproj.astype(cdt)                                           # (E, E)
    bproj2 = bproj.reshape(1, E).astype(jnp.float32)                   # (1, E)

    kernel = functools.partial(_talking_head_kernel, H)

    grid_spec = pltpu.PrefetchScalarGridSpec(
        num_scalar_prefetch=0,
        grid=(B // Bb,),
        in_specs=[
            pl.BlockSpec((Bb, S, E), lambda b: (b, 0, 0)),             # x
            pl.BlockSpec((E, 3 * E), lambda b: (0, 0)),                # W_qkv
            pl.BlockSpec((H * S, E), lambda b: (0, 0)),                # wl_big
            pl.BlockSpec((H * S, H * S), lambda b: (0, 0)),            # ww_kron
            pl.BlockSpec((H * S, 1), lambda b: (0, 0)),                # bw_big
            pl.BlockSpec((H, E), lambda b: (0, 0)),                    # head mask
            pl.BlockSpec((E, E), lambda b: (0, 0)),                    # W_proj
            pl.BlockSpec((1, E), lambda b: (0, 0)),                    # b_proj
        ],
        out_specs=pl.BlockSpec((Bb, S, E), lambda b: (b, 0, 0)),
    )

    return pl.pallas_call(
        kernel,
        out_shape=jax.ShapeDtypeStruct((B, S, E), x.dtype),
        grid_spec=grid_spec,
        compiler_params=pltpu.CompilerParams(
            dimension_semantics=("parallel",)),
    )(x, wqkv_b, wl_big, ww_kron, bw_big, hmask, wp_b, bproj2)


def reference(x, wqkv, wl, bl, ww, bw, wproj, bproj, H):
    """Pure-JAX reproduction of the PyTorch forward (for verification)."""
    B, S, E = x.shape
    hd = E // H
    qkv = x @ wqkv                                                # (B, S, 3E)
    qkv = qkv.reshape(B, S, 3, H, hd).transpose(2, 0, 3, 1, 4)    # (3, B, H, S, hd)
    q, k, v = qkv[0], qkv[1], qkv[2]
    attn = jnp.einsum('bhse,bhte->bhst', q, k)                    # (B, H, S, S)
    attn = jnp.einsum('bhst,gh->bgst', attn, wl) + bl[None, :, None, None]
    attn = jax.nn.softmax(attn, axis=-1)
    attn = jnp.einsum('bhst,gh->bgst', attn, ww) + bw[None, :, None, None]
    out = jnp.einsum('bhst,bhte->bhse', attn, v)                  # (B, H, S, hd)
    out = out.transpose(0, 2, 1, 3).reshape(B, S, E)              # 'b n s e -> b s (n e)'
    return out @ wproj + bproj


if __name__ == "__main__":
    B, S, E, H = 2, 8, 32, 8

    key = jax.random.PRNGKey(0)
    ks = jax.random.split(key, 8)
    x     = jax.random.normal(ks[0], (B, S, E), jnp.float32)
    wqkv  = jax.random.normal(ks[1], (E, 3 * E), jnp.float32) * 0.1
    wl    = jax.random.normal(ks[2], (H, H), jnp.float32) * 0.3
    bl    = jax.random.normal(ks[3], (H,), jnp.float32) * 0.1
    ww    = jax.random.normal(ks[4], (H, H), jnp.float32) * 0.3
    bw    = jax.random.normal(ks[5], (H,), jnp.float32) * 0.1
    wproj = jax.random.normal(ks[6], (E, E), jnp.float32) * 0.1
    bproj = jax.random.normal(ks[7], (E,), jnp.float32) * 0.1

    out = attn_talking_head(x, wqkv, wl, bl, ww, bw, wproj, bproj)
    out = jax.block_until_ready(out)

    ref = reference(x, wqkv, wl, bl, ww, bw, wproj, bproj, H)
    assert out.shape == (B, S, E)
    err = jnp.max(jnp.abs(out - ref))
    # bf16 MXU operands + approx reciprocal -> slightly looser tolerance.
    assert jnp.allclose(out, ref, atol=3e-2, rtol=3e-2), f"max abs diff {err}"
    print("KERNEL_OK")
</pallas_src>

<mosaic_0001>
module attributes {stable_mosaic.version = 11 : i64} {
  func.func @_talking_head_kernel(%arg0: i32, %arg1: memref<2x8x32xf32, #tpu.memory_space<vmem>>, %arg2: memref<32x96xbf16, #tpu.memory_space<vmem>>, %arg3: memref<64x32xbf16, #tpu.memory_space<vmem>>, %arg4: memref<64x64xbf16, #tpu.memory_space<vmem>>, %arg5: memref<64x1xf32, #tpu.memory_space<vmem>>, %arg6: memref<8x32xf32, #tpu.memory_space<vmem>>, %arg7: memref<32x32xbf16, #tpu.memory_space<vmem>>, %arg8: memref<1x32xf32, #tpu.memory_space<vmem>>, %arg9: memref<2x8x32xf32, #tpu.memory_space<vmem>>) attributes {dimension_semantics = [#tpu.dimension_semantics<parallel>], iteration_bounds = array<i64: 1>, scalar_prefetch = 0 : i64, scratch_operands = 0 : i64, tpu.core_type = #tpu.core_type<tc>, window_params = [{transform_indices = @transform_0, window_bounds = array<i64: 2, 8, 32>}, {pipeline_mode = #tpu.pipeline_mode<synchronous>, transform_indices = @transform_1, window_bounds = array<i64: 32, 96>}, {pipeline_mode = #tpu.pipeline_mode<synchronous>, transform_indices = @transform_2, window_bounds = array<i64: 64, 32>}, {pipeline_mode = #tpu.pipeline_mode<synchronous>, transform_indices = @transform_3, window_bounds = array<i64: 64, 64>}, {pipeline_mode = #tpu.pipeline_mode<synchronous>, transform_indices = @transform_4, window_bounds = array<i64: 64, 1>}, {pipeline_mode = #tpu.pipeline_mode<synchronous>, transform_indices = @transform_5, window_bounds = array<i64: 8, 32>}, {pipeline_mode = #tpu.pipeline_mode<synchronous>, transform_indices = @transform_6, window_bounds = array<i64: 32, 32>}, {pipeline_mode = #tpu.pipeline_mode<synchronous>, transform_indices = @transform_7, window_bounds = array<i64: 1, 32>}, {transform_indices = @transform_8, window_bounds = array<i64: 2, 8, 32>}]} {
    %c0 = arith.constant 0 : index
    %c0_0 = arith.constant 0 : index
    %c0_1 = arith.constant 0 : index
    %0 = vector.load %arg1[%c0, %c0_0, %c0_1] : memref<2x8x32xf32, #tpu.memory_space<vmem>>, vector<2x8x32xf32>
    %1 = vector.shape_cast %0 : vector<2x8x32xf32> to vector<16x32xf32>
    %2 = arith.truncf %1 : vector<16x32xf32> to vector<16x32xbf16>
    %c0_2 = arith.constant 0 : index
    %c0_3 = arith.constant 0 : index
    %3 = vector.load %arg2[%c0_2, %c0_3] : memref<32x96xbf16, #tpu.memory_space<vmem>>, vector<32x96xbf16>
    %cst = arith.constant dense<0.000000e+00> : vector<16x96xf32>
    %4 = tpu.matmul %2, %3, %cst {dimension_numbers = #tpu.dot_dimension_numbers<[1], [0], [0], [1], [0, 0, 1, 1], [], []>} : vector<16x32xbf16>, vector<32x96xbf16>, vector<16x96xf32> -> vector<16x96xf32>
    %5 = arith.truncf %4 : vector<16x96xf32> to vector<16x96xbf16>
    %6 = vector.extract_strided_slice %5 {offsets = [0, 0], sizes = [16, 32], strides = [1, 1]} : vector<16x96xbf16> to vector<16x32xbf16>
    %7 = vector.extract_strided_slice %5 {offsets = [0, 32], sizes = [16, 32], strides = [1, 1]} : vector<16x96xbf16> to vector<16x32xbf16>
    %8 = vector.extract_strided_slice %5 {offsets = [0, 64], sizes = [16, 32], strides = [1, 1]} : vector<16x96xbf16> to vector<16x32xbf16>
    %c0_4 = arith.constant 0 : index
    %c0_5 = arith.constant 0 : index
    %9 = vector.load %arg3[%c0_4, %c0_5] : memref<64x32xbf16, #tpu.memory_space<vmem>>, vector<64x32xbf16>
    %c0_6 = arith.constant 0 : index
    %c0_7 = arith.constant 0 : index
    %10 = vector.load %arg4[%c0_6, %c0_7] : memref<64x64xbf16, #tpu.memory_space<vmem>>, vector<64x64xbf16>
    %c0_8 = arith.constant 0 : index
    %c0_9 = arith.constant 0 : index
    %11 = vector.load %arg5[%c0_8, %c0_9] : memref<64x1xf32, #tpu.memory_space<vmem>>, vector<64x1xf32>
    %c0_10 = arith.constant 0 : index
    %c0_11 = arith.constant 0 : index
    %12 = vector.load %arg7[%c0_10, %c0_11] : memref<32x32xbf16, #tpu.memory_space<vmem>>, vector<32x32xbf16>
    %c0_12 = arith.constant 0 : index
    %c0_13 = arith.constant 0 : index
    %13 = vector.load %arg8[%c0_12, %c0_13] : memref<1x32xf32, #tpu.memory_space<vmem>>, vector<1x32xf32>
    %14 = vector.extract_strided_slice %6 {offsets = [0, 0], sizes = [8, 32], strides = [1, 1]} : vector<16x32xbf16> to vector<8x32xbf16>
    %15 = vector.extract_strided_slice %7 {offsets = [0, 0], sizes = [8, 32], strides = [1, 1]} : vector<16x32xbf16> to vector<8x32xbf16>
    %16 = vector.extract_strided_slice %8 {offsets = [0, 0], sizes = [8, 32], strides = [1, 1]} : vector<16x32xbf16> to vector<8x32xbf16>
    %17 = tpu.concatenate %14, %14, %14, %14, %14, %14, %14, %14 in 0 : vector<8x32xbf16>, vector<8x32xbf16>, vector<8x32xbf16>, vector<8x32xbf16>, vector<8x32xbf16>, vector<8x32xbf16>, vector<8x32xbf16>, vector<8x32xbf16> -> vector<64x32xbf16>
    %18 = arith.mulf %17, %9 : vector<64x32xbf16>
    %cst_14 = arith.constant dense<0.000000e+00> : vector<64x8xf32>
    %19 = tpu.matmul %18, %15, %cst_14 {dimension_numbers = #tpu.dot_dimension_numbers<[1], [1], [0], [0], [0, 0, 1, 0], [], []>} : vector<64x32xbf16>, vector<8x32xbf16>, vector<64x8xf32> -> vector<64x8xf32>
    %cst_15 = arith.constant dense<0xFF800000> : vector<64xf32>
    %20 = vector.multi_reduction <maximumf>, %19, %cst_15 [1] : vector<64x8xf32> to vector<64xf32>
    %21 = vector.shape_cast %20 : vector<64xf32> to vector<64x1xf32>
    %22 = vector.broadcast %21 : vector<64x1xf32> to vector<64x8xf32>
    %23 = arith.subf %19, %22 : vector<64x8xf32>
    %24 = math.exp %23 : vector<64x8xf32>
    %cst_16 = arith.constant dense<0.000000e+00> : vector<64xf32>
    %25 = vector.multi_reduction <add>, %24, %cst_16 [1] : vector<64x8xf32> to vector<64xf32>
    %26 = vector.shape_cast %25 : vector<64xf32> to vector<64x1xf32>
    %27 = tpu.reciprocal %26 {approx = true} : vector<64x1xf32> -> vector<64x1xf32>
    %28 = vector.broadcast %27 : vector<64x1xf32> to vector<64x8xf32>
    %29 = arith.mulf %24, %28 : vector<64x8xf32>
    %30 = arith.truncf %29 : vector<64x8xf32> to vector<64x8xbf16>
    %cst_17 = arith.constant dense<0.000000e+00> : vector<64x8xf32>
    %31 = tpu.matmul %10, %30, %cst_17 {dimension_numbers = #tpu.dot_dimension_numbers<[1], [0], [0], [1], [0, 0, 1, 1], [], []>} : vector<64x64xbf16>, vector<64x8xbf16>, vector<64x8xf32> -> vector<64x8xf32>
    %32 = vector.broadcast %11 : vector<64x1xf32> to vector<64x8xf32>
    %33 = arith.addf %31, %32 : vector<64x8xf32>
    %34 = arith.truncf %33 : vector<64x8xf32> to vector<64x8xbf16>
    %cst_18 = arith.constant dense<0.000000e+00> : vector<64x32xf32>
    %35 = tpu.matmul %34, %16, %cst_18 {dimension_numbers = #tpu.dot_dimension_numbers<[1], [0], [0], [1], [0, 0, 1, 1], [], []>} : vector<64x8xbf16>, vector<8x32xbf16>, vector<64x32xf32> -> vector<64x32xf32>
    %36 = vector.extract_strided_slice %35 {offsets = [0, 0], sizes = [8, 32], strides = [1, 1]} : vector<64x32xf32> to vector<8x32xf32>
    %c0_19 = arith.constant 0 : index
    %c0_20 = arith.constant 0 : index
    %37 = vector.load %arg6[%c0_19, %c0_20] : memref<8x32xf32, #tpu.memory_space<vmem>>, vector<1x32xf32>
    %38 = vector.broadcast %37 : vector<1x32xf32> to vector<8x32xf32>
    %39 = arith.mulf %36, %38 : vector<8x32xf32>
    %40 = vector.extract_strided_slice %35 {offsets = [8, 0], sizes = [8, 32], strides = [1, 1]} : vector<64x32xf32> to vector<8x32xf32>
    %c1 = arith.constant 1 : index
    %c0_21 = arith.constant 0 : index
    %41 = vector.load %arg6[%c1, %c0_21] : memref<8x32xf32, #tpu.memory_space<vmem>>, vector<1x32xf32>
    %42 = vector.broadcast %41 : vector<1x32xf32> to vector<8x32xf32>
    %43 = arith.mulf %40, %42 : vector<8x32xf32>
    %44 = arith.addf %39, %43 : vector<8x32xf32>
    %45 = vector.extract_strided_slice %35 {offsets = [16, 0], sizes = [8, 32], strides = [1, 1]} : vector<64x32xf32> to vector<8x32xf32>
    %c2 = arith.constant 2 : index
    %c0_22 = arith.constant 0 : index
    %46 = vector.load %arg6[%c2, %c0_22] : memref<8x32xf32, #tpu.memory_space<vmem>>, vector<1x32xf32>
    %47 = vector.broadcast %46 : vector<1x32xf32> to vector<8x32xf32>
    %48 = arith.mulf %45, %47 : vector<8x32xf32>
    %49 = arith.addf %44, %48 : vector<8x32xf32>
    %50 = vector.extract_strided_slice %35 {offsets = [24, 0], sizes = [8, 32], strides = [1, 1]} : vector<64x32xf32> to vector<8x32xf32>
    %c3 = arith.constant 3 : index
    %c0_23 = arith.constant 0 : index
    %51 = vector.load %arg6[%c3, %c0_23] : memref<8x32xf32, #tpu.memory_space<vmem>>, vector<1x32xf32>
    %52 = vector.broadcast %51 : vector<1x32xf32> to vector<8x32xf32>
    %53 = arith.mulf %50, %52 : vector<8x32xf32>
    %54 = arith.addf %49, %53 : vector<8x32xf32>
    %55 = vector.extract_strided_slice %35 {offsets = [32, 0], sizes = [8, 32], strides = [1, 1]} : vector<64x32xf32> to vector<8x32xf32>
    %c4 = arith.constant 4 : index
    %c0_24 = arith.constant 0 : index
    %56 = vector.load %arg6[%c4, %c0_24] : memref<8x32xf32, #tpu.memory_space<vmem>>, vector<1x32xf32>
    %57 = vector.broadcast %56 : vector<1x32xf32> to vector<8x32xf32>
    %58 = arith.mulf %55, %57 : vector<8x32xf32>
    %59 = arith.addf %54, %58 : vector<8x32xf32>
    %60 = vector.extract_strided_slice %35 {offsets = [40, 0], sizes = [8, 32], strides = [1, 1]} : vector<64x32xf32> to vector<8x32xf32>
    %c5 = arith.constant 5 : index
    %c0_25 = arith.constant 0 : index
    %61 = vector.load %arg6[%c5, %c0_25] : memref<8x32xf32, #tpu.memory_space<vmem>>, vector<1x32xf32>
    %62 = vector.broadcast %61 : vector<1x32xf32> to vector<8x32xf32>
    %63 = arith.mulf %60, %62 : vector<8x32xf32>
    %64 = arith.addf %59, %63 : vector<8x32xf32>
    %65 = vector.extract_strided_slice %35 {offsets = [48, 0], sizes = [8, 32], strides = [1, 1]} : vector<64x32xf32> to vector<8x32xf32>
    %c6 = arith.constant 6 : index
    %c0_26 = arith.constant 0 : index
    %66 = vector.load %arg6[%c6, %c0_26] : memref<8x32xf32, #tpu.memory_space<vmem>>, vector<1x32xf32>
    %67 = vector.broadcast %66 : vector<1x32xf32> to vector<8x32xf32>
    %68 = arith.mulf %65, %67 : vector<8x32xf32>
    %69 = arith.addf %64, %68 : vector<8x32xf32>
    %70 = vector.extract_strided_slice %35 {offsets = [56, 0], sizes = [8, 32], strides = [1, 1]} : vector<64x32xf32> to vector<8x32xf32>
    %c7 = arith.constant 7 : index
    %c0_27 = arith.constant 0 : index
    %71 = vector.load %arg6[%c7, %c0_27] : memref<8x32xf32, #tpu.memory_space<vmem>>, vector<1x32xf32>
    %72 = vector.broadcast %71 : vector<1x32xf32> to vector<8x32xf32>
    %73 = arith.mulf %70, %72 : vector<8x32xf32>
    %74 = arith.addf %69, %73 : vector<8x32xf32>
    %75 = arith.truncf %74 : vector<8x32xf32> to vector<8x32xbf16>
    %cst_28 = arith.constant dense<0.000000e+00> : vector<8x32xf32>
    %76 = tpu.matmul %75, %12, %cst_28 {dimension_numbers = #tpu.dot_dimension_numbers<[1], [0], [0], [1], [0, 0, 1, 1], [], []>} : vector<8x32xbf16>, vector<32x32xbf16>, vector<8x32xf32> -> vector<8x32xf32>
    %77 = vector.broadcast %13 : vector<1x32xf32> to vector<8x32xf32>
    %78 = arith.addf %76, %77 : vector<8x32xf32>
    %c0_29 = arith.constant 0 : index
    %c0_30 = arith.constant 0 : index
    %c0_31 = arith.constant 0 : index
    %79 = vector.load %arg9[%c0_29, %c0_30, %c0_31] : memref<2x8x32xf32, #tpu.memory_space<vmem>>, vector<1x8x32xf32>
    %80 = vector.shape_cast %79 : vector<1x8x32xf32> to vector<8x32xf32>
    %81 = vector.shape_cast %78 : vector<8x32xf32> to vector<1x8x32xf32>
    tpu.vector_store %arg9[%c0_29, %c0_30, %c0_31], %81 {strides = array<i32>} : memref<2x8x32xf32, #tpu.memory_space<vmem>>, vector<1x8x32xf32>,
    %82 = vector.extract_strided_slice %6 {offsets = [8, 0], sizes = [8, 32], strides = [1, 1]} : vector<16x32xbf16> to vector<8x32xbf16>
    %83 = vector.extract_strided_slice %7 {offsets = [8, 0], sizes = [8, 32], strides = [1, 1]} : vector<16x32xbf16> to vector<8x32xbf16>
    %84 = vector.extract_strided_slice %8 {offsets = [8, 0], sizes = [8, 32], strides = [1, 1]} : vector<16x32xbf16> to vector<8x32xbf16>
    %85 = tpu.concatenate %82, %82, %82, %82, %82, %82, %82, %82 in 0 : vector<8x32xbf16>, vector<8x32xbf16>, vector<8x32xbf16>, vector<8x32xbf16>, vector<8x32xbf16>, vector<8x32xbf16>, vector<8x32xbf16>, vector<8x32xbf16> -> vector<64x32xbf16>
    %86 = arith.mulf %85, %9 : vector<64x32xbf16>
    %cst_32 = arith.constant dense<0.000000e+00> : vector<64x8xf32>
    %87 = tpu.matmul %86, %83, %cst_32 {dimension_numbers = #tpu.dot_dimension_numbers<[1], [1], [0], [0], [0, 0, 1, 0], [], []>} : vector<64x32xbf16>, vector<8x32xbf16>, vector<64x8xf32> -> vector<64x8xf32>
    %cst_33 = arith.constant dense<0xFF800000> : vector<64xf32>
    %88 = vector.multi_reduction <maximumf>, %87, %cst_33 [1] : vector<64x8xf32> to vector<64xf32>
    %89 = vector.shape_cast %88 : vector<64xf32> to vector<64x1xf32>
    %90 = vector.broadcast %89 : vector<64x1xf32> to vector<64x8xf32>
    %91 = arith.subf %87, %90 : vector<64x8xf32>
    %92 = math.exp %91 : vector<64x8xf32>
    %cst_34 = arith.constant dense<0.000000e+00> : vector<64xf32>
    %93 = vector.multi_reduction <add>, %92, %cst_34 [1] : vector<64x8xf32> to vector<64xf32>
    %94 = vector.shape_cast %93 : vector<64xf32> to vector<64x1xf32>
    %95 = tpu.reciprocal %94 {approx = true} : vector<64x1xf32> -> vector<64x1xf32>
    %96 = vector.broadcast %95 : vector<64x1xf32> to vector<64x8xf32>
    %97 = arith.mulf %92, %96 : vector<64x8xf32>
    %98 = arith.truncf %97 : vector<64x8xf32> to vector<64x8xbf16>
    %cst_35 = arith.constant dense<0.000000e+00> : vector<64x8xf32>
    %99 = tpu.matmul %10, %98, %cst_35 {dimension_numbers = #tpu.dot_dimension_numbers<[1], [0], [0], [1], [0, 0, 1, 1], [], []>} : vector<64x64xbf16>, vector<64x8xbf16>, vector<64x8xf32> -> vector<64x8xf32>
    %100 = vector.broadcast %11 : vector<64x1xf32> to vector<64x8xf32>
    %101 = arith.addf %99, %100 : vector<64x8xf32>
    %102 = arith.truncf %101 : vector<64x8xf32> to vector<64x8xbf16>
    %cst_36 = arith.constant dense<0.000000e+00> : vector<64x32xf32>
    %103 = tpu.matmul %102, %84, %cst_36 {dimension_numbers = #tpu.dot_dimension_numbers<[1], [0], [0], [1], [0, 0, 1, 1], [], []>} : vector<64x8xbf16>, vector<8x32xbf16>, vector<64x32xf32> -> vector<64x32xf32>
    %104 = vector.extract_strided_slice %103 {offsets = [0, 0], sizes = [8, 32], strides = [1, 1]} : vector<64x32xf32> to vector<8x32xf32>
    %c0_37 = arith.constant 0 : index
    %c0_38 = arith.constant 0 : index
    %105 = vector.load %arg6[%c0_37, %c0_38] : memref<8x32xf32, #tpu.memory_space<vmem>>, vector<1x32xf32>
    %106 = vector.broadcast %105 : vector<1x32xf32> to vector<8x32xf32>
    %107 = arith.mulf %104, %106 : vector<8x32xf32>
    %108 = vector.extract_strided_slice %103 {offsets = [8, 0], sizes = [8, 32], strides = [1, 1]} : vector<64x32xf32> to vector<8x32xf32>
    %c1_39 = arith.constant 1 : index
    %c0_40 = arith.constant 0 : index
    %109 = vector.load %arg6[%c1_39, %c0_40] : memref<8x32xf32, #tpu.memory_space<vmem>>, vector<1x32xf32>
    %110 = vector.broadcast %109 : vector<1x32xf32> to vector<8x32xf32>
    %111 = arith.mulf %108, %110 : vector<8x32xf32>
    %112 = arith.addf %107, %111 : vector<8x32xf32>
    %113 = vector.extract_strided_slice %103 {offsets = [16, 0], sizes = [8, 32], strides = [1, 1]} : vector<64x32xf32> to vector<8x32xf32>
    %c2_41 = arith.constant 2 : index
    %c0_42 = arith.constant 0 : index
    %114 = vector.load %arg6[%c2_41, %c0_42] : memref<8x32xf32, #tpu.memory_space<vmem>>, vector<1x32xf32>
    %115 = vector.broadcast %114 : vector<1x32xf32> to vector<8x32xf32>
    %116 = arith.mulf %113, %115 : vector<8x32xf32>
    %117 = arith.addf %112, %116 : vector<8x32xf32>
    %118 = vector.extract_strided_slice %103 {offsets = [24, 0], sizes = [8, 32], strides = [1, 1]} : vector<64x32xf32> to vector<8x32xf32>
    %c3_43 = arith.constant 3 : index
    %c0_44 = arith.constant 0 : index
    %119 = vector.load %arg6[%c3_43, %c0_44] : memref<8x32xf32, #tpu.memory_space<vmem>>, vector<1x32xf32>
    %120 = vector.broadcast %119 : vector<1x32xf32> to vector<8x32xf32>
    %121 = arith.mulf %118, %120 : vector<8x32xf32>
    %122 = arith.addf %117, %121 : vector<8x32xf32>
    %123 = vector.extract_strided_slice %103 {offsets = [32, 0], sizes = [8, 32], strides = [1, 1]} : vector<64x32xf32> to vector<8x32xf32>
    %c4_45 = arith.constant 4 : index
    %c0_46 = arith.constant 0 : index
    %124 = vector.load %arg6[%c4_45, %c0_46] : memref<8x32xf32, #tpu.memory_space<vmem>>, vector<1x32xf32>
    %125 = vector.broadcast %124 : vector<1x32xf32> to vector<8x32xf32>
    %126 = arith.mulf %123, %125 : vector<8x32xf32>
    %127 = arith.addf %122, %126 : vector<8x32xf32>
    %128 = vector.extract_strided_slice %103 {offsets = [40, 0], sizes = [8, 32], strides = [1, 1]} : vector<64x32xf32> to vector<8x32xf32>
    %c5_47 = arith.constant 5 : index
    %c0_48 = arith.constant 0 : index
    %129 = vector.load %arg6[%c5_47, %c0_48] : memref<8x32xf32, #tpu.memory_space<vmem>>, vector<1x32xf32>
    %130 = vector.broadcast %129 : vector<1x32xf32> to vector<8x32xf32>
    %131 = arith.mulf %128, %130 : vector<8x32xf32>
    %132 = arith.addf %127, %131 : vector<8x32xf32>
    %133 = vector.extract_strided_slice %103 {offsets = [48, 0], sizes = [8, 32], strides = [1, 1]} : vector<64x32xf32> to vector<8x32xf32>
    %c6_49 = arith.constant 6 : index
    %c0_50 = arith.constant 0 : index
    %134 = vector.load %arg6[%c6_49, %c0_50] : memref<8x32xf32, #tpu.memory_space<vmem>>, vector<1x32xf32>
    %135 = vector.broadcast %134 : vector<1x32xf32> to vector<8x32xf32>
    %136 = arith.mulf %133, %135 : vector<8x32xf32>
    %137 = arith.addf %132, %136 : vector<8x32xf32>
    %138 = vector.extract_strided_slice %103 {offsets = [56, 0], sizes = [8, 32], strides = [1, 1]} : vector<64x32xf32> to vector<8x32xf32>
    %c7_51 = arith.constant 7 : index
    %c0_52 = arith.constant 0 : index
    %139 = vector.load %arg6[%c7_51, %c0_52] : memref<8x32xf32, #tpu.memory_space<vmem>>, vector<1x32xf32>
    %140 = vector.broadcast %139 : vector<1x32xf32> to vector<8x32xf32>
    %141 = arith.mulf %138, %140 : vector<8x32xf32>
    %142 = arith.addf %137, %141 : vector<8x32xf32>
    %143 = arith.truncf %142 : vector<8x32xf32> to vector<8x32xbf16>
    %cst_53 = arith.constant dense<0.000000e+00> : vector<8x32xf32>
    %144 = tpu.matmul %143, %12, %cst_53 {dimension_numbers = #tpu.dot_dimension_numbers<[1], [0], [0], [1], [0, 0, 1, 1], [], []>} : vector<8x32xbf16>, vector<32x32xbf16>, vector<8x32xf32> -> vector<8x32xf32>
    %145 = vector.broadcast %13 : vector<1x32xf32> to vector<8x32xf32>
    %146 = arith.addf %144, %145 : vector<8x32xf32>
    %c1_54 = arith.constant 1 : index
    %c0_55 = arith.constant 0 : index
    %c0_56 = arith.constant 0 : index
    %147 = vector.load %arg9[%c1_54, %c0_55, %c0_56] : memref<2x8x32xf32, #tpu.memory_space<vmem>>, vector<1x8x32xf32>
    %148 = vector.shape_cast %147 : vector<1x8x32xf32> to vector<8x32xf32>
    %149 = vector.shape_cast %146 : vector<8x32xf32> to vector<1x8x32xf32>
    tpu.vector_store %arg9[%c1_54, %c0_55, %c0_56], %149 {strides = array<i32>} : memref<2x8x32xf32, #tpu.memory_space<vmem>>, vector<1x8x32xf32>,
    return
  }
  func.func @transform_0(%arg0: i32) -> (i32, i32, i32) {
    %c0_i32 = arith.constant 0 : i32
    %c0_i32_0 = arith.constant 0 : i32
    %c0_i32_1 = arith.constant 0 : i32
    return %arg0, %c0_i32, %c0_i32_0 : i32, i32, i32
  }
  func.func @transform_1(%arg0: i32) -> (i32, i32) {
    %c0_i32 = arith.constant 0 : i32
    %c0_i32_0 = arith.constant 0 : i32
    %c0_i32_1 = arith.constant 0 : i32
    return %c0_i32, %c0_i32_0 : i32, i32
  }
  func.func @transform_2(%arg0: i32) -> (i32, i32) {
    %c0_i32 = arith.constant 0 : i32
    %c0_i32_0 = arith.constant 0 : i32
    %c0_i32_1 = arith.constant 0 : i32
    return %c0_i32, %c0_i32_0 : i32, i32
  }
  func.func @transform_3(%arg0: i32) -> (i32, i32) {
    %c0_i32 = arith.constant 0 : i32
    %c0_i32_0 = arith.constant 0 : i32
    %c0_i32_1 = arith.constant 0 : i32
    return %c0_i32, %c0_i32_0 : i32, i32
  }
  func.func @transform_4(%arg0: i32) -> (i32, i32) {
    %c0_i32 = arith.constant 0 : i32
    %c0_i32_0 = arith.constant 0 : i32
    %c0_i32_1 = arith.constant 0 : i32
    return %c0_i32, %c0_i32_0 : i32, i32
  }
  func.func @transform_5(%arg0: i32) -> (i32, i32) {
    %c0_i32 = arith.constant 0 : i32
    %c0_i32_0 = arith.constant 0 : i32
    %c0_i32_1 = arith.constant 0 : i32
    return %c0_i32, %c0_i32_0 : i32, i32
  }
  func.func @transform_6(%arg0: i32) -> (i32, i32) {
    %c0_i32 = arith.constant 0 : i32
    %c0_i32_0 = arith.constant 0 : i32
    %c0_i32_1 = arith.constant 0 : i32
    return %c0_i32, %c0_i32_0 : i32, i32
  }
  func.func @transform_7(%arg0: i32) -> (i32, i32) {
    %c0_i32 = arith.constant 0 : i32
    %c0_i32_0 = arith.constant 0 : i32
    %c0_i32_1 = arith.constant 0 : i32
    return %c0_i32, %c0_i32_0 : i32, i32
  }
  func.func @transform_8(%arg0: i32) -> (i32, i32, i32) {
    %c0_i32 = arith.constant 0 : i32
    %c0_i32_0 = arith.constant 0 : i32
    %c0_i32_1 = arith.constant 0 : i32
    return %arg0, %c0_i32, %c0_i32_0 : i32, i32, i32
  }
}

</mosaic_0001>

<bundles_post_ra>
// kernel: tpu_custom_call.1
= control target key start
LH: loop header
LB: loop body
LE: loop exit
PB: predicated region body
PF: predicated region fallthrough
CT: control target
= control target key end

     0   :  { %v1436_v1 = vmov 0.0   ;;  %vm1437_vm0 = vmmov 0   ;;  %vm50_vm1 = vcmask 261120   ;;  %s1830_s0 = inlined_call_operand.vmem [shape: f32[2,8,32], index: 0, kind: input, shape index: {}]   ;;  %s1831_s1 = inlined_call_operand.vmem [shape: bf16[32,96], index: 1, kind: input, shape index: {}]   ;;  %s1832_s2 = inlined_call_operand.vmem [shape: bf16[64,32], index: 2, kind: input, shape index: {}]   ;;  %s1833_s3 = inlined_call_operand.vmem [shape: bf16[64,64], index: 3, kind: input, shape index: {}]   ;;  %s1834_s4 = inlined_call_operand.vmem [shape: f32[64,1], index: 4, kind: input, shape index: {}]   ;;  %s1835_s5 = inlined_call_operand.vmem [shape: f32[8,32], index: 5, kind: input, shape index: {}]   ;;  %s1836_s6 = inlined_call_operand.vmem [shape: bf16[32,32], index: 6, kind: input, shape index: {}]   ;;  %s1837_s7 = inlined_call_operand.vmem [shape: f32[1,32], index: 7, kind: input, shape index: {}]   ;;  %s1838_s8 = inlined_call_operand.hbm [shape: f32[2,8,32], index: 8, kind: output, shape index: {}]  }
   0x1   :  { %v1336_v0 = vld [vmem:[%s1831_s1] sm:$0xff]   ;;  %1226 = vmatprep.subr.bf16.mxu0 %v1436_v1  ;;  %v1337_v2 = vld [vmem:[%s1831_s1 + $0x8] sm:$0xff]   ;;  %1230 = vmatprep.mubr.msk.bf16.mxu0 %vm1437_vm0, %v1436_v1 }
   0x2   :  { %1227 = vmatpush3.bf16.msra.mxu0 %v1336_v0  ;;  %v31_v3 = vld [vmem:[%s1830_s0] sm:$0xff]  ;;  %v32_v4 = vld [vmem:[%s1830_s0 + $0x8] sm:$0xff] }
   0x3   :  { %1228 = vmatprep.subr.bf16.mxu0 %v1436_v1  ;;  %v33_v5 = vpack.c.bf16 %v32_v4, %v31_v3 }
   0x6   :  { %1229 = vmatpush3.bf16.msra.mxu0 %v1337_v2 }
   0x9   :  { %1231 = vmatmul.mubr.msk.bf16.vlgmr.msra.gmra.mrb[0].mxu0 %vm50_vm1, %v33_v5 }
   0xa   :  { %13 = vsyncpa [#allocation3], 0  ;;  %vm127_vm2 = vcmask 1043456   ;;  %v1511_v11 = vld [vmem:[%s1832_s2] sm:$0xff]   ;;  %s1438_s0 = smov 96   ;;  %v1528_v17 = vld [vmem:[%s1832_s2 + $0x8] sm:$0xff]  }
   0xb   :  { %v1533_v18 = vld [vmem:[%s1832_s2 + $0x10] sm:$0xff]   ;;  %v1542_v21 = vld [vmem:[%s1832_s2 + $0x18] sm:$0xff]   ;;  %vm242_vm3 = vcmask 64512   ;;  %v1439_v39 = vmov 0   ;;  %vm395_vm4 = vcmask 523264   ;;  %s1440_s11 = smov 64  }
   0xc   :  { %1335 = vset.pattern.permute.xlu1 %v1439_v39  ;;  %1334 = vset.pattern.permute.xlu0 %v1439_v39 }
  0xdc   :  { %v88_v6 = vpop.f32.mrb[0].mxu0 }
  0xdd   :  { %v1232_v7 = vpop.f32.mrb[1].mxu0 }
  0xde   :  { %v91_v8 = vpop.f32.mrb[2].mxu0 }
  0xdf   :  { %v1506_v9 = vpack.c.bf16 %v91_v8, %v88_v6  ;;  %v1233_v10 = vpop.f32.mrb[3].mxu0 }
  0xe1   :  { %v1514_v12 = vrot.slane %v1506_v9, 4  ;;  %160 = vrot.lane.b32.xlu0 %v1506_v9, %s1438_s0 }
  0xe3   :  { %v130_v13 = vsel %vm127_vm2, %v1506_v9, %v1514_v12 }
  0xe4   :  { %v156_v14 = vmul.bf16 %v1511_v11, %v130_v13  ;;  %v157_v19 = vmul.bf16 %v1528_v17, %v130_v13  ;;  %v158_v20 = vmul.bf16 %v1533_v18, %v130_v13  ;;  %v159_v22 = vmul.bf16 %v1542_v21, %v130_v13 }
  0xe6   :  { %1236 = vmatprep.mubr.msk.bf16.mxu1 %vm50_vm1, %v156_v14 }
 0x153   :  { %v161_v15 = vpop.permute.xlu0 %160 }
 0x154   :  { %1322 = vmatprep.subr.msk.bf16.mxu1 %vm50_vm1, %v161_v15  ;;  %v175_v16 = vsel %vm50_vm1, %v161_v15, 0 }
 0x155   :  { %1235 = vmatpush3.bf16.xpose.msra.mxu1 %v175_v16 }
 0x15c   :  { %1237 = vmatmul.mubr.msk.bf16.vlgmr.msra.gmra.mrb[0].mxu1 %vm50_vm1, %v157_v19 }
 0x15d   :  { %1240 = vmatprep.mubr.msk.bf16.mxu1 %vm50_vm1, %v158_v20 }
 0x164   :  { %1241 = vmatmul.mubr.msk.bf16.gmra.mrb[4].mxu1 %vm50_vm1, %v159_v22 }
 0x22f   :  { %v1238_v23 = vpop.f32.mrb[0].mxu1 }
 0x230   :  { %v211_v24 = vpop.f32.mrb[1].mxu1  ;;  %v249_v25 = vsel %vm242_vm3, %v1238_v23, -inf }
 0x231   :  { %250 = vmax.xlane.f32.xlu1 %v249_v25  ;;  %v1239_v26 = vpop.f32.mrb[2].mxu1  ;;  %v243_v27 = vsel %vm242_vm3, %v211_v24, -inf  ;;  %v114_v25 = vld [vmem:[%s1834_s4 + $0x10] sm:$0xff] }
 0x232   :  { %244 = vmax.xlane.f32.xlu0 %v243_v27  ;;  %v214_v28 = vpop.f32.mrb[3].mxu1  ;;  %v252_v29 = vsel %vm242_vm3, %v1239_v26, -inf  ;;  %v116_v27 = vld [vmem:[%s1834_s4 + $0x20] sm:$0xff] }
 0x233   :  { %v246_v32 = vsel %vm242_vm3, %v214_v28, -inf }
 0x235   :  { %253 = vmax.xlane.f32.xlu1 %v252_v29  ;;  %v1606_v29 = vld [vmem:[%s1833_s3] sm:$0xff]  }
 0x236   :  { %1252 = vmatprep.mubr.msk.bf16.mxu0 %vm395_vm4, %v1606_v29 }
 0x237   :  { %v1242_v30 = vpop.f32.mrb[4].mxu1 }
 0x238   :  { %v227_v31 = vpop.f32.mrb[5].mxu1  ;;  %v261_v35 = vsel %vm242_vm3, %v1242_v30, -inf }
 0x239   :  { %247 = vmax.xlane.f32.xlu1 %v246_v32  ;;  %v1243_v33 = vpop.f32.mrb[6].mxu1  ;;  %v255_v36 = vsel %vm242_vm3, %v227_v31, -inf }
 0x23a   :  { %v230_v34 = vpop.f32.mrb[7].mxu1  ;;  %v264_v38 = vsel %vm242_vm3, %v1243_v33, -inf }
 0x23b   :  { %v258_v37 = vsel %vm242_vm3, %v230_v34, -inf }
 0x23d   :  { %262 = vmax.xlane.f32.xlu1 %v261_v35 }
 0x241   :  { %256 = vmax.xlane.f32.xlu1 %v255_v36 }
 0x245   :  { %259 = vmax.xlane.f32.xlu1 %v258_v37 }
 0x249   :  { %265 = vmax.xlane.f32.xlu1 %v264_v38 }
 0x2be   :  { %v251_v40 = vpop.xlane.xlu1 %250 }
 0x2bf   :  { %v269_v41 = vsub.f32 %v1238_v23, %v251_v40  ;;  %v245_v42 = vpop.xlane.xlu0 %244  ;;  %v113_v23 = vld [vmem:[%s1834_s4 + $0x8] sm:$0xff] }
 0x2c0   :  { %v267_v43 = vsub.f32 %v211_v24, %v245_v42  ;;  %v112_v24 = vld [vmem:[%s1834_s4] sm:$0xff] }
 0x2c1   :  { %v279_v44 = vmul.f32 1.442695, %v269_v41 }
 0x2c2   :  { %v275_v45 = vmul.f32 1.442695, %v267_v43  ;;  %v254_v46 = vpop.xlane.xlu1 %253 }
 0x2c3   :  { %1348 = vpow2.f32 %v279_v44  ;;  %v270_v47 = vsub.f32 %v1239_v26, %v254_v46  ;;  %v115_v26 = vld [vmem:[%s1834_s4 + $0x18] sm:$0xff] }
 0x2c4   :  { %1350 = vpow2.f32 %v275_v45 }
 0x2c5   :  { %v281_v50 = vmul.f32 1.442695, %v270_v47 }
 0x2c6   :  { %v248_v48 = vpop.xlane.xlu1 %247 }
 0x2c7   :  { %v268_v49 = vsub.f32 %v214_v28, %v248_v48  ;;  %v117_v28 = vld [vmem:[%s1834_s4 + $0x28] sm:$0xff] }
 0x2c9   :  { %v277_v51 = vmul.f32 1.442695, %v268_v49 }
 0x2ca   :  { %v263_v52 = vpop.xlane.xlu1 %262 }
 0x2cb   :  { %1352 = vpow2.f32 %v277_v51  ;;  %v273_v54 = vsub.f32 %v1242_v30, %v263_v52  ;;  %v118_v30 = vld [vmem:[%s1834_s4 + $0x30] sm:$0xff] }
 0x2cc   :  { %1354 = vpow2.f32 %v281_v50 }
 0x2cd   :  { %v1554_v53 = vpop.eup %1348  ;;  %v287_v60 = vmul.f32 1.442695, %v273_v54 }
 0x2ce   :  { %v1556_v55 = vpop.eup %1350  ;;  %v257_v56 = vpop.xlane.xlu1 %256  ;;  %v297_v57 = vsel %vm242_vm3, %v1554_v53, 0.0 }
 0x2cf   :  { %v271_v58 = vsub.f32 %v227_v31, %v257_v56  ;;  %298 = vadd.xlane.f32.xlu0 %v297_v57  ;;  %v291_v59 = vsel %vm242_vm3, %v1556_v55, 0.0  ;;  %v119_v31 = vld [vmem:[%s1834_s4 + $0x38] sm:$0xff] }
 0x2d0   :  { %292 = vadd.xlane.f32.xlu1 %v291_v59 }
 0x2d1   :  { %v283_v61 = vmul.f32 1.442695, %v271_v58 }
 0x2d2   :  { %v260_v62 = vpop.xlane.xlu1 %259 }
 0x2d3   :  { %1356 = vpow2.f32 %v283_v61  ;;  %v272_v63 = vsub.f32 %v230_v34, %v260_v62 }
 0x2d4   :  { %1358 = vpow2.f32 %v287_v60 }
 0x2d5   :  { %v1353_v0 = vpop.eup %1352  ;;  %v285_v2 = vmul.f32 1.442695, %v272_v63 }
 0x2d6   :  { %v266_v3 = vpop.xlane.xlu1 %265  ;;  %v294_v4 = vsel %vm242_vm3, %v1353_v0, 0.0  ;;  %v1563_v5 = vpop.eup %1354 }
 0x2d7   :  { %1360 = vpow2.f32 %v285_v2  ;;  %v274_v6 = vsub.f32 %v1243_v33, %v266_v3  ;;  %295 = vadd.xlane.f32.xlu1 %v294_v4  ;;  %v300_v8 = vsel %vm242_vm3, %v1563_v5, 0.0  ;;  %v1641_v2 = vld [vmem:[%s1833_s3 + $0x10] sm:$0xff]  }
 0x2d9   :  { %v289_v7 = vmul.f32 1.442695, %v274_v6 }
 0x2db   :  { %1362 = vpow2.f32 %v289_v7  ;;  %301 = vadd.xlane.f32.xlu1 %v300_v8  ;;  %v1657_v7 = vld [vmem:[%s1833_s3 + $0x18] sm:$0xff]  }
 0x2dd   :  { %v1567_v10 = vpop.eup %1356 }
 0x2de   :  { %v303_v13 = vsel %vm242_vm3, %v1567_v10, 0.0  ;;  %v1571_v14 = vpop.eup %1358 }
 0x2df   :  { %304 = vadd.xlane.f32.xlu0 %v303_v13  ;;  %v309_v16 = vsel %vm242_vm3, %v1571_v14, 0.0 }
 0x2e1   :  { %v1573_v15 = vpop.eup %1360 }
 0x2e2   :  { %v306_v19 = vsel %vm242_vm3, %v1573_v15, 0.0 }
 0x2e3   :  { %310 = vadd.xlane.f32.xlu0 %v309_v16  ;;  %307 = vadd.xlane.f32.xlu1 %v306_v19 }
 0x2e5   :  { %v1579_v20 = vpop.eup %1362 }
 0x2e6   :  { %v312_v22 = vsel %vm242_vm3, %v1579_v20, 0.0 }
 0x2e7   :  { %313 = vadd.xlane.f32.xlu1 %v312_v22 }
 0x2f8   :  { %342 = vperm.xlu1 %1335, %v113_v23  }
 0x2f9   :  { %337 = vperm.xlu0 %1334, %v112_v24  }
 0x2fc   :  { %347 = vperm.xlu1 %1335, %v114_v25  }
 0x2fd   :  { %683 = vrot.lane.b32.xlu0 %v1514_v12, %s1438_s0 }
 0x300   :  { %352 = vperm.xlu1 %1335, %v115_v26  }
 0x304   :  { %357 = vperm.xlu1 %1335, %v116_v27  }
 0x308   :  { %362 = vperm.xlu1 %1335, %v117_v28  }
 0x30c   :  { %477 = vrot.lane.b32.xlu1 %v1506_v9, %s1440_s11 }
 0x310   :  { %367 = vperm.xlu1 %1335, %v118_v30  }
 0x314   :  { %372 = vperm.xlu1 %1335, %v119_v31  }
 0x35c   :  { %v299_v33 = vpop.xlane.xlu0 %298 }
 0x35d   :  { %v293_v32 = vpop.xlane.xlu1 %292 }
 0x35e   :  { %1364 = vrcp.f32 %v293_v32 }
 0x364   :  { %v296_v34 = vpop.xlane.xlu1 %295 }
 0x365   :  { %1366 = vrcp.f32 %v296_v34 }
 0x366   :  { %1368 = vrcp.f32 %v299_v33 }
 0x368   :  { %v302_v35 = vpop.xlane.xlu1 %301  ;;  %v1365_v37 = vpop.eup %1364 }
 0x369   :  { %1370 = vrcp.f32 %v302_v35  ;;  %v323_v41 = vmul.f32 %v1365_v37, %v1556_v55  ;;  %v677_v37 = vsel %vm127_vm2, %v1514_v12, %v1506_v9 }
 0x36a   :  { %v682_v9 = vmul.bf16 %v1542_v21, %v677_v37 }
 0x36c   :  { %v305_v36 = vpop.xlane.xlu0 %304 }
 0x36d   :  { %1372 = vrcp.f32 %v305_v36 }
 0x36f   :  { %v1367_v38 = vpop.eup %1366 }
 0x370   :  { %v311_v39 = vpop.xlane.xlu0 %310  ;;  %v308_v40 = vpop.xlane.xlu1 %307  ;;  %v324_v42 = vmul.f32 %v1367_v38, %v1353_v0  ;;  %v1636_v0 = vld [vmem:[%s1833_s3 + $0x8] sm:$0xff]  }
 0x371   :  { %v1369_v43 = vpop.eup %1368  ;;  %1374 = vrcp.f32 %v308_v40  ;;  %v679_v40 = vmul.bf16 %v1511_v11, %v677_v37  ;;  %v1695_v11 = vld [vmem:[%s1836_s6] sm:$0xff]  }
 0x372   :  { %v331_v44 = vpack.c.bf16 %v324_v42, %v323_v41  ;;  %1376 = vrcp.f32 %v311_v39  ;;  %v325_v47 = vmul.f32 %v1369_v43, %v1554_v53  ;;  %v680_v41 = vmul.bf16 %v1528_v17, %v677_v37  ;;  %v1702_v17 = vld [vmem:[%s1836_s6 + $0x8] sm:$0xff]   ;;  %v1708_v43 = vld [vmem:[%s1835_s5] ss:$0 sm:$0xff] }
 0x373   :  { %v1371_v45 = vpop.eup %1370  ;;  %v681_v42 = vmul.bf16 %v1533_v18, %v677_v37 }
 0x374   :  { %1244 = vmatprep.subr.bf16.mxu0 %v331_v44  ;;  %v314_v46 = vpop.xlane.xlu1 %313  ;;  %v326_v48 = vmul.f32 %v1371_v45, %v1563_v5 }
 0x375   :  { %1378 = vrcp.f32 %v314_v46  ;;  %1245 = vmatpush3.bf16.msra.mxu0 %v331_v44  ;;  %v1713_v44 = vld [vmem:[%s1835_s5 + $0x1] ss:$0 sm:$0xff]  ;;  %v1718_v46 = vld [vmem:[%s1835_s5 + $0x2] ss:$0 sm:$0xff] }
 0x376   :  { %v332_v49 = vpack.c.bf16 %v326_v48, %v325_v47 }
 0x377   :  { %v1373_v51 = vpop.eup %1372 }
 0x378   :  { %1246 = vmatprep.subr.bf16.mxu0 %v332_v49  ;;  %v1621_v50 = vpop.permute.xlu1 %342  ;;  %v327_v56 = vmul.f32 %v1373_v51, %v1567_v10  ;;  %v1644_v3 = vpop.permute.xlu0 %337  ;;  %v1725_v51 = vld [vmem:[%s1835_s5 + $0x3] ss:$0 sm:$0xff] }
 0x379   :  { %1247 = vmatpush3.bf16.msra.mxu0 %v332_v49 }
 0x37b   :  { %v1375_v52 = vpop.eup %1374 }
 0x37c   :  { %v1623_v54 = vpop.permute.xlu1 %347  ;;  %v1377_v55 = vpop.eup %1376  ;;  %v328_v57 = vmul.f32 %v1375_v52, %v1573_v15 }
 0x37d   :  { %v329_v60 = vmul.f32 %v1377_v55, %v1571_v14  ;;  %v684_v8 = vpop.permute.xlu0 %683 }
 0x37e   :  { %v333_v53 = vpack.c.bf16 %v328_v57, %v327_v56  ;;  %v698_v27 = vsel %vm50_vm1, %v684_v8, 0  ;;  %v1731_v56 = vld [vmem:[%s1835_s5 + $0x4] ss:$0 sm:$0xff] }
 0x37f   :  { %v1379_v58 = vpop.eup %1378 }
 0x380   :  { %v1627_v59 = vpop.permute.xlu1 %352  ;;  %v330_v61 = vmul.f32 %v1379_v58, %v1579_v20  ;;  %1248 = vmatprep.subr.bf16.mxu0 %v333_v53 }
 0x381   :  { %1249 = vmatpush3.bf16.msra.mxu0 %v333_v53 }
 0x382   :  { %v334_v62 = vpack.c.bf16 %v330_v61, %v329_v60  ;;  %v1737_v61 = vld [vmem:[%s1835_s5 + $0x5] ss:$0 sm:$0xff] }
 0x384   :  { %1250 = vmatprep.subr.bf16.mxu0 %v334_v62  ;;  %v1631_v63 = vpop.permute.xlu1 %357 }
 0x385   :  { %1251 = vmatpush3.bf16.msra.mxu0 %v334_v62 }
 0x386   :  { %1270 = vmatprep.subr.bf16.mxu0 %v1436_v1 }
 0x388   :  { %v1646_v4 = vpop.permute.xlu1 %362  ;;  %1253 = vmatmul.mubr.msk.bf16.vlgmr.msra.gmra.mrb[4].mxu0 %vm395_vm4, %v1636_v0 }
 0x389   :  { %1256 = vmatprep.mubr.msk.bf16.mxu0 %vm395_vm4, %v1641_v2  ;;  %1271 = vmatpush3.bf16.msra.mxu0 %v1695_v11 }
 0x38a   :  { %1272 = vmatprep.subr.bf16.mxu0 %v1436_v1 }
 0x38c   :  { %v478_v5 = vpop.permute.xlu1 %477 }
 0x38d   :  { %v492_v6 = vsel %vm127_vm2, %v478_v5, 0  ;;  %1323 = vmatprep.subr.msk.bf16.mxu1 %vm127_vm2, %v478_v5  ;;  %1273 = vmatpush3.bf16.msra.mxu0 %v1702_v17 }
 0x38e   :  { %1261 = vmatpush3.bf16.msra.mxu1 %v492_v6 }
 0x38f   :  { %1324 = vmatprep.subr.msk.bf16.mxu1 %vm50_vm1, %v684_v8  ;;  %v1743_v8 = vld [vmem:[%s1835_s5 + $0x6] ss:$0 sm:$0xff] }
 0x390   :  { %1257 = vmatmul.mubr.msk.bf16.gmra.mrb[8].mxu0 %vm395_vm4, %v1657_v7  ;;  %v1666_v20 = vpop.permute.xlu1 %367 }
 0x391   :  { %1274 = vmatprep.mubr.msk.bf16.mxu0 %vm1437_vm0, %v1436_v1 }
 0x394   :  { %v1673_v30 = vpop.permute.xlu1 %372 }
 0x45b   :  { %v1254_v10 = vpop.f32.mrb[4].mxu0 }
 0x45c   :  { %v442_v13 = vpop.f32.mrb[5].mxu0  ;;  %v451_v15 = vadd.f32 %v1254_v10, %v1623_v54 }
 0x45d   :  { %v1255_v14 = vpop.f32.mrb[6].mxu0  ;;  %v443_v22 = vadd.f32 %v442_v13, %v1644_v3 }
 0x45e   :  { %v454_v16 = vadd.f32 %v1255_v14, %v1627_v59  ;;  %v445_v19 = vpop.f32.mrb[7].mxu0 }
 0x45f   :  { %v446_v23 = vadd.f32 %v445_v19, %v1621_v50 }
 0x460   :  { %v474_v24 = vpack.c.bf16 %v454_v16, %v451_v15  ;;  %v1749_v15 = vld [vmem:[%s1835_s5 + $0x7] ss:$0 sm:$0xff] }
 0x461   :  { %v473_v25 = vpack.c.bf16 %v446_v23, %v443_v22 }
 0x463   :  { %v1258_v26 = vpop.f32.mrb[8].mxu0  ;;  %1262 = vmatprep.mubr.msk.bf16.mxu1 %vm242_vm3, %v473_v25 }
 0x464   :  { %v458_v28 = vpop.f32.mrb[9].mxu0  ;;  %1263 = vmatmul.mubr.msk.bf16.vlgmr.msra.gmra.mrb[8].mxu1 %vm242_vm3, %v474_v24  ;;  %v467_v32 = vadd.f32 %v1258_v26, %v1666_v20 }
 0x465   :  { %1279 = vmatpush3.bf16.xpose.msra.mxu1 %v698_v27  ;;  %v1259_v31 = vpop.f32.mrb[10].mxu0  ;;  %v459_v35 = vadd.f32 %v458_v28, %v1631_v63 }
 0x466   :  { %v470_v33 = vadd.f32 %v1259_v31, %v1673_v30  ;;  %v461_v34 = vpop.f32.mrb[11].mxu0 }
 0x467   :  { %v462_v36 = vadd.f32 %v461_v34, %v1646_v4 }
 0x468   :  { %v476_v38 = vpack.c.bf16 %v470_v33, %v467_v32 }
 0x469   :  { %v475_v39 = vpack.c.bf16 %v462_v36, %v459_v35 }
 0x46b   :  { %1266 = vmatprep.mubr.msk.bf16.mxu1 %vm242_vm3, %v475_v39 }
 0x46c   :  { %1267 = vmatmul.mubr.msk.bf16.gmra.mrb[12].mxu1 %vm242_vm3, %v476_v38 }
 0x46d   :  { %1280 = vmatprep.mubr.msk.bf16.mxu1 %vm50_vm1, %v679_v40 }
 0x474   :  { %1281 = vmatmul.mubr.msk.bf16.vlgmr.msra.gmra.mrb[16].mxu1 %vm50_vm1, %v680_v41 }
 0x475   :  { %1284 = vmatprep.mubr.msk.bf16.mxu1 %vm50_vm1, %v681_v42 }
 0x47c   :  { %1285 = vmatmul.mubr.msk.bf16.gmra.mrb[20].mxu1 %vm50_vm1, %v682_v9 }
 0x537   :  { %v1264_v18 = vpop.f32.mrb[8].mxu1 }
 0x538   :  { %v528_v21 = vpop.f32.mrb[9].mxu1  ;;  %v577_v52 = vmul.f32 %v1264_v18, %v1718_v46 }
 0x539   :  { %v1265_v45 = vpop.f32.mrb[10].mxu1  ;;  %v564_v48 = vmul.f32 %v1708_v43, %v528_v21 }
 0x53a   :  { %v531_v47 = vpop.f32.mrb[11].mxu1  ;;  %v584_v57 = vmul.f32 %v1265_v45, %v1725_v51 }
 0x53b   :  { %v570_v49 = vmul.f32 %v1713_v44, %v531_v47 }
 0x53d   :  { %v571_v55 = vadd.f32 %v570_v49, %v564_v48 }
 0x53f   :  { %v578_v58 = vadd.f32 %v577_v52, %v571_v55  ;;  %v1268_v53 = vpop.f32.mrb[12].mxu1 }
 0x540   :  { %v544_v60 = vpop.f32.mrb[13].mxu1  ;;  %v605_v16 = vmul.f32 %v1268_v53, %v1743_v8 }
 0x541   :  { %v585_v62 = vadd.f32 %v584_v57, %v578_v58  ;;  %v591_v5 = vmul.f32 %v1731_v56, %v544_v60  ;;  %v1269_v6 = vpop.f32.mrb[14].mxu1 }
 0x542   :  { %v547_v10 = vpop.f32.mrb[15].mxu1  ;;  %v612_v22 = vmul.f32 %v1269_v6, %v1749_v15 }
 0x543   :  { %v592_v13 = vadd.f32 %v591_v5, %v585_v62  ;;  %v598_v14 = vmul.f32 %v1737_v61, %v547_v10 }
 0x545   :  { %v599_v19 = vadd.f32 %v598_v14, %v592_v13 }
 0x547   :  { %v606_v23 = vadd.f32 %v605_v16, %v599_v19  ;;  %v1282_v24 = vpop.f32.mrb[16].mxu1 }
 0x548   :  { %v734_v25 = vpop.f32.mrb[17].mxu1  ;;  %v771_v36 = vsel %vm242_vm3, %v1282_v24, -inf }
 0x549   :  { %v613_v26 = vadd.f32 %v612_v22, %v606_v23  ;;  %v1283_v27 = vpop.f32.mrb[18].mxu1  ;;  %v765_v28 = vsel %vm242_vm3, %v734_v25, -inf }
 0x54a   :  { %766 = vmax.xlane.f32.xlu1 %v765_v28  ;;  %v737_v31 = vpop.f32.mrb[19].mxu1  ;;  %v774_v34 = vsel %vm242_vm3, %v1283_v27, -inf }
 0x54b   :  { %v614_v32 = vpack.c.bf16 %v613_v26, %v613_v26  ;;  %v768_v33 = vsel %vm242_vm3, %v737_v31, -inf }
 0x54c   :  { %769 = vmax.xlane.f32.xlu0 %v768_v33 }
 0x54d   :  { %1275 = vmatmul.mubr.msk.bf16.vlgmr.msra.gmra.mrb[12].mxu0 %vm50_vm1, %v614_v32 }
 0x54e   :  { %775 = vmax.xlane.f32.xlu1 %v774_v34  ;;  %1296 = vmatprep.mubr.msk.bf16.mxu0 %vm395_vm4, %v1606_v29 }
 0x54f   :  { %v1286_v35 = vpop.f32.mrb[20].mxu1 }
 0x550   :  { %772 = vmax.xlane.f32.xlu0 %v771_v36  ;;  %v750_v37 = vpop.f32.mrb[21].mxu1  ;;  %v783_v42 = vsel %vm242_vm3, %v1286_v35, -inf }
 0x551   :  { %v1287_v38 = vpop.f32.mrb[22].mxu1  ;;  %v777_v40 = vsel %vm242_vm3, %v750_v37, -inf }
 0x552   :  { %v753_v39 = vpop.f32.mrb[23].mxu1  ;;  %v786_v9 = vsel %vm242_vm3, %v1287_v38, -inf }
 0x553   :  { %v780_v41 = vsel %vm242_vm3, %v753_v39, -inf }
 0x554   :  { %778 = vmax.xlane.f32.xlu0 %v777_v40  ;;  %781 = vmax.xlane.f32.xlu1 %v780_v41 }
 0x558   :  { %784 = vmax.xlane.f32.xlu0 %v783_v42  ;;  %787 = vmax.xlane.f32.xlu1 %v786_v9  ;;  %v1777_v9 = vld [vmem:[%s1837_s7] ss:$0 sm:$0xff]  ;;  %s1441_s7 = smov [#allocation2]  }
 0x5d7   :  { %v767_v29 = vpop.xlane.xlu1 %766 }
 0x5d8   :  { %v789_v18 = vsub.f32 %v734_v25, %v767_v29 }
 0x5d9   :  { %v770_v21 = vpop.xlane.xlu0 %769 }
 0x5da   :  { %v797_v45 = vmul.f32 1.442695, %v789_v18  ;;  %v790_v47 = vsub.f32 %v737_v31, %v770_v21 }
 0x5db   :  { %v776_v48 = vpop.xlane.xlu1 %775 }
 0x5dc   :  { %1380 = vpow2.f32 %v797_v45  ;;  %v799_v49 = vmul.f32 1.442695, %v790_v47  ;;  %v792_v52 = vsub.f32 %v1283_v27, %v776_v48 }
 0x5dd   :  { %v773_v55 = vpop.xlane.xlu0 %772 }
 0x5de   :  { %1382 = vpow2.f32 %v799_v49  ;;  %v803_v57 = vmul.f32 1.442695, %v792_v52  ;;  %v791_v58 = vsub.f32 %v1282_v24, %v773_v55 }
 0x5e0   :  { %1384 = vpow2.f32 %v803_v57  ;;  %v801_v53 = vmul.f32 1.442695, %v791_v58 }
 0x5e1   :  { %v779_v60 = vpop.xlane.xlu0 %778  ;;  %v782_v62 = vpop.xlane.xlu1 %781 }
 0x5e2   :  { %1386 = vpow2.f32 %v801_v53  ;;  %v793_v5 = vsub.f32 %v750_v37, %v779_v60  ;;  %v794_v6 = vsub.f32 %v753_v39, %v782_v62 }
 0x5e4   :  { %v805_v10 = vmul.f32 1.442695, %v793_v5  ;;  %v807_v13 = vmul.f32 1.442695, %v794_v6 }
 0x5e5   :  { %v785_v14 = vpop.xlane.xlu0 %784  ;;  %v788_v16 = vpop.xlane.xlu1 %787 }
 0x5e6   :  { %v1381_v19 = vpop.eup %1380  ;;  %1388 = vpow2.f32 %v805_v10  ;;  %v795_v22 = vsub.f32 %v1286_v35, %v785_v14  ;;  %v796_v23 = vsub.f32 %v1287_v38, %v788_v16 }
 0x5e7   :  { %1390 = vpow2.f32 %v807_v13  ;;  %v813_v25 = vsel %vm242_vm3, %v1381_v19, 0.0 }
 0x5e8   :  { %v1383_v26 = vpop.eup %1382  ;;  %v809_v24 = vmul.f32 1.442695, %v795_v22  ;;  %v811_v27 = vmul.f32 1.442695, %v796_v23  ;;  %814 = vadd.xlane.f32.xlu0 %v813_v25 }
 0x5e9   :  { %v816_v28 = vsel %vm242_vm3, %v1383_v26, 0.0 }
 0x5ea   :  { %v1385_v31 = vpop.eup %1384  ;;  %1392 = vpow2.f32 %v809_v24  ;;  %817 = vadd.xlane.f32.xlu1 %v816_v28 }
 0x5eb   :  { %1394 = vpow2.f32 %v811_v27  ;;  %v822_v34 = vsel %vm242_vm3, %v1385_v31, 0.0 }
 0x5ec   :  { %v1387_v32 = vpop.eup %1386 }
 0x5ed   :  { %v819_v33 = vsel %vm242_vm3, %v1387_v32, 0.0 }
 0x5ee   :  { %820 = vadd.xlane.f32.xlu0 %v819_v33  ;;  %823 = vadd.xlane.f32.xlu1 %v822_v34 }
 0x5f0   :  { %v1389_v35 = vpop.eup %1388 }
 0x5f1   :  { %v1391_v36 = vpop.eup %1390  ;;  %v825_v37 = vsel %vm242_vm3, %v1389_v35, 0.0 }
 0x5f2   :  { %826 = vadd.xlane.f32.xlu0 %v825_v37  ;;  %v828_v38 = vsel %vm242_vm3, %v1391_v36, 0.0 }
 0x5f3   :  { %829 = vadd.xlane.f32.xlu1 %v828_v38 }
 0x5f4   :  { %v1393_v39 = vpop.eup %1392 }
 0x5f5   :  { %v1395_v40 = vpop.eup %1394  ;;  %v831_v41 = vsel %vm242_vm3, %v1393_v39, 0.0 }
 0x5f6   :  { %832 = vadd.xlane.f32.xlu0 %v831_v41  ;;  %v834_v42 = vsel %vm242_vm3, %v1395_v40, 0.0 }
 0x5f7   :  { %835 = vadd.xlane.f32.xlu1 %v834_v42 }
 0x60c   :  { %926 = vrot.lane.b32.xlu0 %v1514_v12, %s1440_s11  ;;  %s1114_s11 = sshll.u32 %s1441_s7, 4  ;;  %s1115_s11 = int_to_ptr.vmem [resolvable:$true] %s1114_s11 }
 0x60d   :  { %s1412_s4 = scalar_lea.vmem %s1115_s11, 256  ;;  %p1417_p1 = scmp.lt.s32.totalorder %s1115_s11, %s1115_s11 }
 0x60e   :  { %p1413_p0 = scmp.ne.s32.totalorder %s1115_s11, %s1412_s4  ;;  %p1418_p2 = scmp.lt.s32.totalorder %s1412_s4, %s1412_s4 }
 0x610   :  { %p1419_p3 = por %p1418_p2, %p1417_p1 }
 0x612   :  { %p1420_p4 = pnand %p1419_p3, %p1413_p0 }
 0x620   :  { %v670_v29 = vpop.f32.mrb[12].mxu0 }
 0x621   :  { %v671_v18 = vadd.f32 %v1777_v9, %v670_v29  ;;  %v1276_v21 = vpop.f32.mrb[13].mxu0 }
 0x622   :  { %v673_v45 = vpop.f32.mrb[14].mxu0 }
 0x623   :  { %676 = vst.msk [vmem:[#allocation2] sm:$0xff] %vm50_vm1, %v671_v18  ;;  %v1277_v47 = vpop.f32.mrb[15].mxu0 }
 0x675   :  { %v815_v48 = vpop.xlane.xlu0 %814 }
 0x676   :  { %1396 = vrcp.f32 %v815_v48 }
 0x677   :  { %v818_v49 = vpop.xlane.xlu1 %817 }
 0x678   :  { %1398 = vrcp.f32 %v818_v49 }
 0x67b   :  { %v821_v52 = vpop.xlane.xlu0 %820  ;;  %v824_v55 = vpop.xlane.xlu1 %823 }
 0x67c   :  { %1400 = vrcp.f32 %v821_v52 }
 0x67d   :  { %1402 = vrcp.f32 %v824_v55 }
 0x67f   :  { %v827_v12 = vpop.xlane.xlu0 %826 }
 0x680   :  { %v1397_v57 = vpop.eup %1396  ;;  %1404 = vrcp.f32 %v827_v12  ;;  %v830_v58 = vpop.xlane.xlu1 %829 }
 0x681   :  { %1406 = vrcp.f32 %v830_v58  ;;  %v845_v62 = vmul.f32 %v1397_v57, %v1381_v19 }
 0x682   :  { %v1399_v53 = vpop.eup %1398 }
 0x683   :  { %v833_v60 = vpop.xlane.xlu0 %832  ;;  %v846_v5 = vmul.f32 %v1399_v53, %v1383_v26 }
 0x684   :  { %1408 = vrcp.f32 %v833_v60  ;;  %v836_v6 = vpop.xlane.xlu1 %835 }
 0x685   :  { %1410 = vrcp.f32 %v836_v6  ;;  %v853_v10 = vpack.c.bf16 %v846_v5, %v845_v62 }
 0x686   :  { %v1401_v13 = vpop.eup %1400 }
 0x687   :  { %v1403_v14 = vpop.eup %1402  ;;  %v927_v16 = vpop.permute.xlu0 %926  ;;  %1288 = vmatprep.subr.bf16.mxu0 %v853_v10  ;;  %v847_v22 = vmul.f32 %v1401_v13, %v1387_v32 }
 0x688   :  { %v941_v23 = vsel %vm127_vm2, %v927_v16, 0  ;;  %1289 = vmatpush3.bf16.msra.mxu0 %v853_v10  ;;  %1325 = vmatprep.subr.msk.bf16.mxu1 %vm127_vm2, %v927_v16  ;;  %v848_v25 = vmul.f32 %v1403_v14, %v1385_v31 }
 0x689   :  { %1305 = vmatpush3.bf16.msra.mxu1 %v941_v23 }
 0x68a   :  { %v1405_v24 = vpop.eup %1404  ;;  %v854_v27 = vpack.c.bf16 %v848_v25, %v847_v22 }
 0x68b   :  { %v1407_v19 = vpop.eup %1406  ;;  %v849_v26 = vmul.f32 %v1405_v24, %v1389_v35 }
 0x68c   :  { %1290 = vmatprep.subr.bf16.mxu0 %v854_v27  ;;  %v850_v28 = vmul.f32 %v1407_v19, %v1391_v36 }
 0x68d   :  { %1291 = vmatpush3.bf16.msra.mxu0 %v854_v27 }
 0x68e   :  { %v1409_v33 = vpop.eup %1408  ;;  %v855_v34 = vpack.c.bf16 %v850_v28, %v849_v26 }
 0x68f   :  { %v1411_v37 = vpop.eup %1410  ;;  %v851_v38 = vmul.f32 %v1409_v33, %v1393_v39 }
 0x690   :  { %1292 = vmatprep.subr.bf16.mxu0 %v855_v34  ;;  %v852_v32 = vmul.f32 %v1411_v37, %v1395_v40 }
 0x691   :  { %1293 = vmatpush3.bf16.msra.mxu0 %v855_v34 }
 0x692   :  { %v856_v41 = vpack.c.bf16 %v852_v32, %v851_v38 }
 0x694   :  { %1294 = vmatprep.subr.bf16.mxu0 %v856_v41 }
 0x695   :  { %1295 = vmatpush3.bf16.msra.mxu0 %v856_v41 }
 0x696   :  { %1314 = vmatprep.subr.bf16.mxu0 %v1436_v1 }
 0x698   :  { %1297 = vmatmul.mubr.msk.bf16.vlgmr.msra.gmra.mrb[16].mxu0 %vm395_vm4, %v1636_v0 }
 0x699   :  { %1300 = vmatprep.mubr.msk.bf16.mxu0 %vm395_vm4, %v1641_v2  ;;  %1315 = vmatpush3.bf16.msra.mxu0 %v1695_v11 }
 0x69a   :  { %1316 = vmatprep.subr.bf16.mxu0 %v1436_v1 }
 0x69d   :  { %1317 = vmatpush3.bf16.msra.mxu0 %v1702_v17 }
 0x6a0   :  { %1301 = vmatmul.mubr.msk.bf16.gmra.mrb[20].mxu0 %vm395_vm4, %v1657_v7 }
 0x6a1   :  { %1318 = vmatprep.mubr.msk.bf16.mxu0 %vm1437_vm0, %v1436_v1 }
 0x76b   :  { %v1298_v31 = vpop.f32.mrb[16].mxu0 }
 0x76c   :  { %v891_v35 = vpop.f32.mrb[17].mxu0  ;;  %v900_v0 = vadd.f32 %v1298_v31, %v1623_v54 }
 0x76d   :  { %v1299_v36 = vpop.f32.mrb[18].mxu0  ;;  %v892_v11 = vadd.f32 %v891_v35, %v1644_v3 }
 0x76e   :  { %v903_v39 = vadd.f32 %v1299_v36, %v1627_v59  ;;  %v894_v2 = vpop.f32.mrb[19].mxu0 }
 0x76f   :  { %v895_v40 = vadd.f32 %v894_v2, %v1621_v50 }
 0x770   :  { %v923_v42 = vpack.c.bf16 %v903_v39, %v900_v0 }
 0x771   :  { %v922_v17 = vpack.c.bf16 %v895_v40, %v892_v11 }
 0x773   :  { %v1302_v29 = vpop.f32.mrb[20].mxu0  ;;  %1306 = vmatprep.mubr.msk.bf16.mxu1 %vm242_vm3, %v922_v17 }
 0x774   :  { %v907_v7 = vpop.f32.mrb[21].mxu0  ;;  %1307 = vmatmul.mubr.msk.bf16.vlgmr.msra.gmra.mrb[24].mxu1 %vm242_vm3, %v923_v42  ;;  %v916_v18 = vadd.f32 %v1302_v29, %v1666_v20 }
 0x775   :  { %v1303_v1 = vpop.f32.mrb[22].mxu0  ;;  %v908_v59 = vadd.f32 %v907_v7, %v1631_v63 }
 0x776   :  { %v919_v54 = vadd.f32 %v1303_v1, %v1673_v30  ;;  %v910_v21 = vpop.f32.mrb[23].mxu0 }
 0x777   :  { %v911_v3 = vadd.f32 %v910_v21, %v1646_v4 }
 0x778   :  { %v925_v45 = vpack.c.bf16 %v919_v54, %v916_v18 }
 0x779   :  { %v924_v50 = vpack.c.bf16 %v911_v3, %v908_v59 }
 0x77b   :  { %1310 = vmatprep.mubr.msk.bf16.mxu1 %vm242_vm3, %v924_v50 }
 0x77c   :  { %1311 = vmatmul.mubr.msk.bf16.gmra.mrb[28].mxu1 %vm242_vm3, %v925_v45 }
 0x847   :  { %v1308_v47 = vpop.f32.mrb[24].mxu1 }
 0x848   :  { %v977_v48 = vpop.f32.mrb[25].mxu1  ;;  %v1026_v30 = vmul.f32 %v1308_v47, %v1718_v46 }
 0x849   :  { %v1309_v49 = vpop.f32.mrb[26].mxu1  ;;  %v1013_v55 = vmul.f32 %v1708_v43, %v977_v48 }
 0x84a   :  { %v980_v52 = vpop.f32.mrb[27].mxu1  ;;  %v1033_v63 = vmul.f32 %v1309_v49, %v1725_v51 }
 0x84b   :  { %v1019_v20 = vmul.f32 %v1713_v44, %v980_v52 }
 0x84d   :  { %v1020_v12 = vadd.f32 %v1019_v20, %v1013_v55 }
 0x84f   :  { %v1027_v4 = vadd.f32 %v1026_v30, %v1020_v12  ;;  %v1312_v57 = vpop.f32.mrb[28].mxu1 }
 0x850   :  { %v993_v58 = vpop.f32.mrb[29].mxu1  ;;  %v1054_v43 = vmul.f32 %v1312_v57, %v1743_v8 }
 0x851   :  { %v1034_v53 = vadd.f32 %v1033_v63, %v1027_v4  ;;  %v1040_v60 = vmul.f32 %v1731_v56, %v993_v58  ;;  %v1313_v62 = vpop.f32.mrb[30].mxu1 }
 0x852   :  { %v996_v5 = vpop.f32.mrb[31].mxu1  ;;  %v1061_v44 = vmul.f32 %v1313_v62, %v1749_v15 }
 0x853   :  { %v1041_v6 = vadd.f32 %v1040_v60, %v1034_v53  ;;  %v1047_v10 = vmul.f32 %v1737_v61, %v996_v5 }
 0x855   :  { %v1048_v13 = vadd.f32 %v1047_v10, %v1041_v6 }
 0x857   :  { %v1055_v46 = vadd.f32 %v1054_v43, %v1048_v13 }
 0x859   :  { %v1062_v14 = vadd.f32 %v1061_v44, %v1055_v46 }
 0x85b   :  { %v1063_v16 = vpack.c.bf16 %v1062_v14, %v1062_v14 }
 0x85d   :  { %1319 = vmatmul.mubr.msk.bf16.vlgmr.msra.gmra.mrb[24].mxu0 %vm50_vm1, %v1063_v16 }
 0x930   :  { %v1101_v51 = vpop.f32.mrb[24].mxu0 }
 0x931   :  { %v1102_v56 = vadd.f32 %v1777_v9, %v1101_v51  ;;  %v1320_v22 = vpop.f32.mrb[25].mxu0 }
 0x932   :  { %v1104_v23 = vpop.f32.mrb[26].mxu0 }
 0x933   :  { %1108 = vst.msk [vmem:[#allocation2 + $0x8] sm:$0xff] %vm50_vm1, %v1102_v56  ;;  %v1321_v61 = vpop.f32.mrb[27].mxu0 }
 0x934   :  { %1423 = shalt.err (!%p1420_p4)
}
 0x935   :  { %s1424_s16 = scalar_lea.hbm %s1838_s8, 256 }
 0x936   :  { %p1425_p5 = scmp.ne.s32.totalorder %s1838_s8, %s1424_s16  ;;  %p1428_p6 = scmp.lt.u32.totalorder %s1424_s16, %s1838_s8 }
 0x938   :  { %p1430_p7 = pnand %p1428_p6, %p1425_p5 }
 0x93a   :  { %1433 = shalt.err (!%p1430_p7)
}
 0x93b   :  { %s1442_s2 = smov 128   ;;  %s1443_s20 = smov 8  }
 0x93c   :  { %1120 = dma.vmem_to_hbm [thread:$0]  %s1115_s11, 256, %s1838_s8, [#allocation3], %s1442_s2, %s1442_s2, %s1443_s20  }
 0x93d   :  { %1434 = dma.done.wait [#allocation3], 256  }
 0x93e   :  { %1435 = vsyncadd [#allocation3], 4294967040 }
 0x93f   :  { %1124 = vsyncpa [#allocation3], 1 }

</bundles_post_ra>
